<compile_context>
chip_gen: v5e
topology: v5e:2x2
jax: 0.10.0
libtpu: 0.0.40
codegen_flags: <defaults>
</compile_context>

<pallas_src>
import functools

import jax
import jax.numpy as jnp
from jax import lax
from jax.experimental import pallas as pl
from jax.experimental.pallas import tpu as pltpu


def _gmm_kernel(C, K, sigma_eps, rho_eps, u_ref, z_ref, uni_ref, nrm_ref):
    U = (C + 3) * K + 1  # [color(C*K) | mu_x(K) | mu_y(K) | rho(K) | scale(1)]

    # ---------------- uniform group: one full-block FMA -----------------------
    # Per-column scale/offset chosen with an iota mask; single unsliced store.
    col = lax.broadcasted_iota(jnp.int32, (1, U), 1)
    is_rho = (col >= (C + 2) * K) & (col < (C + 3) * K)
    is_scale = col == (U - 1)
    one_m_rho = 1.0 - rho_eps
    scale_row = jnp.where(is_scale, 1.0, jnp.where(is_rho, 2.0 * one_m_rho, 2.0))
    offset_row = jnp.where(is_scale, 0.0, jnp.where(is_rho, -one_m_rho, -1.0))
    uni_ref[...] = u_ref[...] * scale_row + offset_row

    # ---------------- normal group: [sigma_x | sigma_y | pi] ------------------
    z = z_ref[...]                                  # (NB, 3K)
    e = jnp.exp(z)                                  # shared by softplus & softmax
    # softplus: |z| << 20 for jax.random.normal draws, so torch's threshold
    # branch is dead code and log(1 + e) is exact enough.
    sig = jnp.log(1.0 + e[:, : 2 * K]) + sigma_eps
    p = e[:, 2 * K : 3 * K]
    # softmax over K without max-subtraction (normals bounded, no overflow);
    # exact divide keeps sum(pi) == 1 to float precision.
    pi = p / jnp.sum(p, axis=-1, keepdims=True)
    # One concatenate in registers, one full-block store (no column-offset
    # read-modify-write stores into the ref).
    nrm_ref[...] = jnp.concatenate([sig, pi], axis=-1)


class RandomGMMParameters:
    """JAX/Pallas port of the PyTorch RandomGMMParameters module."""

    def __init__(self, C, K, sigma_eps=0.01, rho_eps=0.01):
        self.C = C
        self.K = K
        self.sigma_eps = float(sigma_eps)
        self.rho_eps = float(rho_eps)

    def __call__(self, N, key):
        C, K = self.C, self.K
        U = (C + 3) * K + 1      # color | mu_x | mu_y | rho | scale
        Z = 3 * K                # sigma_x | sigma_y | pi

        # TODO(synk): distributions match the torch module; the random stream is
        # not bit-identical to torch's RNG.
        ku, kz = jax.random.split(key)
        u_all = jax.random.uniform(ku, (N, U), dtype=jnp.float32)
        z_all = jax.random.normal(kz, (N, Z), dtype=jnp.float32)

        # Row tiling: cap blocks at 2048 rows (multiple of 8).  For N >= 16
        # force >= 2 grid steps so the "parallel" axis shards across both
        # TensorCores on v7x; for tiny N use one full block.
        if N < 16:
            NB = N
        else:
            NB = min(2048, ((N + 1) // 2 + 7) // 8 * 8)
        grid = (pl.cdiv(N, NB),)

        kernel = functools.partial(_gmm_kernel, C, K, self.sigma_eps, self.rho_eps)

        uni, nrm = pl.pallas_call(
            kernel,
            out_shape=(
                jax.ShapeDtypeStruct((N, U), jnp.float32),
                jax.ShapeDtypeStruct((N, Z), jnp.float32),
            ),
            grid=grid,
            in_specs=[
                pl.BlockSpec((NB, U), lambda i: (i, 0)),
                pl.BlockSpec((NB, Z), lambda i: (i, 0)),
            ],
            out_specs=(
                pl.BlockSpec((NB, U), lambda i: (i, 0)),
                pl.BlockSpec((NB, Z), lambda i: (i, 0)),
            ),
            compiler_params=pltpu.CompilerParams(
                dimension_semantics=("parallel",)),
        )(u_all, z_all)

        # Unpack to PyTorch's 5-D layout (wrapper-side slices/reshapes).
        A = C * K
        color = uni[:, :A].reshape(N, C, 1, 1, K)
        mu_x = uni[:, A:A + K].reshape(N, 1, 1, 1, K)
        mu_y = uni[:, A + K:A + 2 * K].reshape(N, 1, 1, 1, K)
        rho = uni[:, A + 2 * K:A + 3 * K].reshape(N, 1, 1, 1, K)
        scale = uni[:, A + 3 * K:A + 3 * K + 1].reshape(N, 1, 1, 1, 1)
        sigma_x = nrm[:, :K].reshape(N, 1, 1, 1, K)
        sigma_y = nrm[:, K:2 * K].reshape(N, 1, 1, 1, K)
        pi = nrm[:, 2 * K:3 * K].reshape(N, 1, 1, 1, K)
        return (color, mu_x, mu_y, sigma_x, sigma_y, rho, pi, scale)


if __name__ == "__main__":
    N, C, K = 2, 4, 8
    key = jax.random.PRNGKey(0)

    module = RandomGMMParameters(C=C, K=K, sigma_eps=0.01, rho_eps=0.01)
    outs = module(N, key)
    outs = jax.block_until_ready(outs)
    color, mu_x, mu_y, sigma_x, sigma_y, rho, pi, scale = outs

    # Shape checks (PyTorch 5-D layout).
    assert color.shape == (N, C, 1, 1, K)
    assert mu_x.shape == (N, 1, 1, 1, K) and mu_y.shape == (N, 1, 1, 1, K)
    assert sigma_x.shape == (N, 1, 1, 1, K) and sigma_y.shape == (N, 1, 1, 1, K)
    assert rho.shape == (N, 1, 1, 1, K) and pi.shape == (N, 1, 1, 1, K)
    assert scale.shape == (N, 1, 1, 1, 1)

    # Range / math sanity checks (forward-pass semantics of the torch module).
    for t in outs:
        assert bool(jnp.all(jnp.isfinite(t)))
    assert bool(jnp.all((color >= -1.0) & (color < 1.0)))
    assert bool(jnp.all((mu_x >= -1.0) & (mu_x < 1.0)))
    assert bool(jnp.all((mu_y >= -1.0) & (mu_y < 1.0)))
    assert bool(jnp.all(sigma_x > 0.0)) and bool(jnp.all(sigma_y > 0.0))
    assert bool(jnp.all(jnp.abs(rho) <= (1.0 - 0.01) + 1e-6))
    assert bool(jnp.all(pi > 0.0))
    assert bool(jnp.all(jnp.abs(jnp.sum(pi, axis=-1) - 1.0) < 1e-5))
    assert bool(jnp.all((scale >= 0.0) & (scale < 1.0)))

    print("KERNEL_OK")
</pallas_src>

<mosaic_0001>
module attributes {stable_mosaic.version = 11 : i64} {
  func.func @_gmm_kernel(%arg0: i32, %arg1: memref<2x57xf32, #tpu.memory_space<vmem>>, %arg2: memref<2x24xf32, #tpu.memory_space<vmem>>, %arg3: memref<2x57xf32, #tpu.memory_space<vmem>>, %arg4: memref<2x24xf32, #tpu.memory_space<vmem>>) attributes {dimension_semantics = [#tpu.dimension_semantics<parallel>], iteration_bounds = array<i64: 1>, scalar_prefetch = 0 : i64, scratch_operands = 0 : i64, tpu.core_type = #tpu.core_type<tc>, window_params = [{transform_indices = @transform_0, window_bounds = array<i64: 2, 57>}, {transform_indices = @transform_1, window_bounds = array<i64: 2, 24>}, {transform_indices = @transform_2, window_bounds = array<i64: 2, 57>}, {transform_indices = @transform_3, window_bounds = array<i64: 2, 24>}]} {
    %0 = tpu.iota {dimensions = array<i32: 1>} : vector<1x57xi32>
    %c48_i32 = arith.constant 48 : i32
    %1 = vector.broadcast %c48_i32 : i32 to vector<1x57xi32>
    %2 = arith.cmpi sge, %0, %1 : vector<1x57xi32>
    %c56_i32 = arith.constant 56 : i32
    %3 = vector.broadcast %c56_i32 : i32 to vector<1x57xi32>
    %4 = arith.cmpi slt, %0, %3 : vector<1x57xi32>
    %5 = arith.andi %2, %4 : vector<1x57xi1>
    %c56_i32_0 = arith.constant 56 : i32
    %6 = vector.broadcast %c56_i32_0 : i32 to vector<1x57xi32>
    %7 = arith.cmpi eq, %0, %6 : vector<1x57xi32>
    %cst = arith.constant 1.980000e+00 : f32
    %cst_1 = arith.constant 2.000000e+00 : f32
    %8 = vector.broadcast %cst : f32 to vector<1x57xf32>
    %9 = vector.broadcast %cst_1 : f32 to vector<1x57xf32>
    %10 = arith.select %5, %8, %9 : vector<1x57xi1>, vector<1x57xf32>
    %cst_2 = arith.constant 1.000000e+00 : f32
    %11 = vector.broadcast %cst_2 : f32 to vector<1x57xf32>
    %12 = arith.select %7, %11, %10 : vector<1x57xi1>, vector<1x57xf32>
    %cst_3 = arith.constant -9.900000e-01 : f32
    %cst_4 = arith.constant -1.000000e+00 : f32
    %13 = vector.broadcast %cst_3 : f32 to vector<1x57xf32>
    %14 = vector.broadcast %cst_4 : f32 to vector<1x57xf32>
    %15 = arith.select %5, %13, %14 : vector<1x57xi1>, vector<1x57xf32>
    %cst_5 = arith.constant 0.000000e+00 : f32
    %16 = vector.broadcast %cst_5 : f32 to vector<1x57xf32>
    %17 = arith.select %7, %16, %15 : vector<1x57xi1>, vector<1x57xf32>
    %c0 = arith.constant 0 : index
    %c0_6 = arith.constant 0 : index
    %18 = vector.load %arg1[%c0, %c0_6] : memref<2x57xf32, #tpu.memory_space<vmem>>, vector<2x57xf32>
    %19 = vector.broadcast %12 : vector<1x57xf32> to vector<2x57xf32>
    %20 = arith.mulf %18, %19 : vector<2x57xf32>
    %21 = vector.broadcast %17 : vector<1x57xf32> to vector<2x57xf32>
    %22 = arith.addf %20, %21 : vector<2x57xf32>
    %c0_7 = arith.constant 0 : index
    %c0_8 = arith.constant 0 : index
    %23 = vector.load %arg3[%c0_7, %c0_8] : memref<2x57xf32, #tpu.memory_space<vmem>>, vector<2x57xf32>
    tpu.vector_store %arg3[%c0_7, %c0_8], %22 {strides = array<i32>} : memref<2x57xf32, #tpu.memory_space<vmem>>, vector<2x57xf32>,
    %c0_9 = arith.constant 0 : index
    %c0_10 = arith.constant 0 : index
    %24 = vector.load %arg2[%c0_9, %c0_10] : memref<2x24xf32, #tpu.memory_space<vmem>>, vector<2x24xf32>
    %25 = math.exp %24 : vector<2x24xf32>
    %26 = vector.extract_strided_slice %25 {offsets = [0, 0], sizes = [2, 16], strides = [1, 1]} : vector<2x24xf32> to vector<2x16xf32>
    %cst_11 = arith.constant 1.000000e+00 : f32
    %27 = vector.broadcast %cst_11 : f32 to vector<2x16xf32>
    %28 = arith.addf %27, %26 : vector<2x16xf32>
    %29 = math.log %28 : vector<2x16xf32>
    %cst_12 = arith.constant 0.00999999977 : f32
    %30 = vector.broadcast %cst_12 : f32 to vector<2x16xf32>
    %31 = arith.addf %29, %30 : vector<2x16xf32>
    %32 = vector.extract_strided_slice %25 {offsets = [0, 16], sizes = [2, 8], strides = [1, 1]} : vector<2x24xf32> to vector<2x8xf32>
    %cst_13 = arith.constant dense<0.000000e+00> : vector<2xf32>
    %33 = vector.multi_reduction <add>, %32, %cst_13 [1] : vector<2x8xf32> to vector<2xf32>
    %34 = vector.shape_cast %33 : vector<2xf32> to vector<2x1xf32>
    %35 = vector.broadcast %34 : vector<2x1xf32> to vector<2x8xf32>
    %36 = arith.divf %32, %35 : vector<2x8xf32>
    %37 = tpu.concatenate %31, %36 in 1 : vector<2x16xf32>, vector<2x8xf32> -> vector<2x24xf32>
    %c0_14 = arith.constant 0 : index
    %c0_15 = arith.constant 0 : index
    %38 = vector.load %arg4[%c0_14, %c0_15] : memref<2x24xf32, #tpu.memory_space<vmem>>, vector<2x24xf32>
    tpu.vector_store %arg4[%c0_14, %c0_15], %37 {strides = array<i32>} : memref<2x24xf32, #tpu.memory_space<vmem>>, vector<2x24xf32>,
    return
  }
  func.func @transform_0(%arg0: i32) -> (i32, i32) {
    %c0_i32 = arith.constant 0 : i32
    %c0_i32_0 = arith.constant 0 : i32
    return %arg0, %c0_i32 : i32, i32
  }
  func.func @transform_1(%arg0: i32) -> (i32, i32) {
    %c0_i32 = arith.constant 0 : i32
    %c0_i32_0 = arith.constant 0 : i32
    return %arg0, %c0_i32 : i32, i32
  }
  func.func @transform_2(%arg0: i32) -> (i32, i32) {
    %c0_i32 = arith.constant 0 : i32
    %c0_i32_0 = arith.constant 0 : i32
    return %arg0, %c0_i32 : i32, i32
  }
  func.func @transform_3(%arg0: i32) -> (i32, i32) {
    %c0_i32 = arith.constant 0 : i32
    %c0_i32_0 = arith.constant 0 : i32
    return %arg0, %c0_i32 : i32, i32
  }
}

</mosaic_0001>

<bundles_post_ra>
// kernel: tpu_custom_call.1
= control target key start
LH: loop header
LB: loop body
LE: loop exit
PB: predicated region body
PF: predicated region fallthrough
CT: control target
= control target key end

     0   :  { %9 = vsyncpa [#allocation3], 0  ;;  %s282_s0 = inlined_call_operand.hbm [shape: f32[2,57], index: 0, kind: input, shape index: {}]   ;;  %s283_s1 = inlined_call_operand.hbm [shape: f32[2,24], index: 1, kind: input, shape index: {}]   ;;  %s284_s2 = inlined_call_operand.hbm [shape: f32[2,57], index: 2, kind: output, shape index: {0}]   ;;  %s285_s3 = inlined_call_operand.hbm [shape: f32[2,24], index: 3, kind: output, shape index: {1}]  }
   0x1   :  { %10 = vsyncpa [#allocation6], 0 }
   0x2   :  { %11 = vsyncpa [#allocation4], 0 }
   0x3   :  { %12 = vsyncpa [#allocation9], 0  ;;  %s18_s14 = sshll.u32 %s282_s0, 4  ;;  %s243_s15 = smov [#allocation2]   ;;  %s19_s14 = int_to_ptr.hbm [resolvable:$true] %s18_s14 }
   0x4   :  { %s20_s16 = sshll.u32 %s243_s15, 4  ;;  %s29_s19 = sshll.u32 %s283_s1, 4  ;;  %s21_s16 = int_to_ptr.vmem [resolvable:$true] %s20_s16  ;;  %s30_s19 = int_to_ptr.hbm [resolvable:$true] %s29_s19 }
   0x5   :  { %23 = dma.hbm_to_vmem [thread:$0]  %s19_s14, 32, %s21_s16, [#allocation3]  }
   0x6   :  { %s244_s20 = smov [#allocation5]  }
   0x7   :  { %s31_s21 = sshll.u32 %s244_s20, 4  ;;  %s32_s21 = int_to_ptr.vmem [resolvable:$true] %s31_s21 }
   0x8   :  { %34 = dma.hbm_to_vmem [thread:$0]  %s30_s19, 32, %s32_s21, [#allocation6]  }
   0x9   :  { %235 = dma.done.wait [#allocation3], 32  }
   0xa   :  { %236 = vsyncadd [#allocation3], 4294967264 }
   0xb   :  { %237 = dma.done.wait [#allocation6], 32  }
   0xc   :  { %238 = vsyncadd [#allocation6], 4294967264  ;;  %v58_v0 = vld [vmem:[#allocation5] sm:$0x3]  ;;  %s245_s0 = smov 112   ;;  %vm69_vm0 = vcmask 58368   ;;  %v43_v5 = vlaneseq }
   0xd   :  { %v59_v1 = vmul.f32 1.442695, %v58_v0  ;;  %v246_v7 = vmov 2.0   ;;  %v53_v10 = vld [vmem:[#allocation2] sm:$0x3]  ;;  %s247_s1 = smov [#allocation7]  }
   0xe   :  { %v44_v6 = vand.u32 127, %v43_v5  ;;  %s97_s22 = sshll.u32 %s247_s1, 4  ;;  %s99_s25 = sshll.u32 %s284_s2, 4  ;;  %v248_v11 = vmov -1.0   ;;  %vm56_vm5 = vcmask 459776   ;;  %vm88_vm10 = vcmask 130048   ;;  %s98_s22 = int_to_ptr.vmem [resolvable:$true] %s97_s22  ;;  %s100_s25 = int_to_ptr.hbm [resolvable:$true] %s99_s25 }
   0xf   :  { %133 = vpow2.f32 %v59_v1  ;;  %s249_s2 = smov [#allocation8]   ;;  %s110_s29 = sshll.u32 %s285_s3, 4  ;;  %vm90_vm11 = vcmask 189440   ;;  %s111_s29 = int_to_ptr.hbm [resolvable:$true] %s110_s29 }
  0x10   :  { %vm45_vm1 = vcmp.ge.s32.totalorder %v44_v6, 48  ;;  %vm46_vm2 = vcmp.lt.s32.totalorder %v44_v6, 56  ;;  %vm48_vm4 = vcmp.eq.s32.totalorder %v44_v6, 56  ;;  %s108_s26 = sshll.u32 %s249_s2, 4  ;;  %s109_s26 = int_to_ptr.vmem [resolvable:$true] %s108_s26 }
  0x11   :  { %vm47_vm3 = vmand %vm45_vm1, %vm46_vm2 }
  0x12   :  { %v49_v8 = vsel %vm47_vm3, 1.98, %v246_v7  ;;  %v51_v12 = vsel %vm47_vm3, -0.99, %v248_v11 }
  0x13   :  { %v50_v9 = vsel %vm48_vm4, 1.0, %v49_v8  ;;  %v52_v14 = vsel %vm48_vm4, 0.0, %v51_v12 }
  0x14   :  { %v54_v13 = vmul.f32 %v53_v10, %v50_v9 }
  0x15   :  { %v134_v2 = vpop.eup %133 }
  0x16   :  { %66 = vrot.lane.b32.xlu0 %v134_v2, %s245_s0  ;;  %v55_v15 = vadd.f32 %v54_v13, %v52_v14  ;;  %v61_v16 = vadd.f32 1.0, %v134_v2 }
  0x18   :  { %57 = vst.msk [vmem:[#allocation7] sm:$0x3] %vm56_vm5, %v55_v15 }
  0x19   :  { %102 = dma.vmem_to_hbm [thread:$0]  %s98_s22, 32, %s100_s25, [#allocation4]  }
  0x88   :  { %v67_v3 = vpop.permute.xlu0 %66 }
  0x89   :  { %v70_v4 = vsel %vm69_vm0, %v67_v3, 0.0 }
  0x8a   :  { %71 = vadd.xlane.f32.xlu0 %v70_v4 }
  0xfd   :  { %v72_v17 = vpop.xlane.xlu0 %71 }
  0xfe   :  { %135 = vrcp.f32 %v72_v17  ;;  %v84_v22 = vand.u32 2147483648, %v72_v17  ;;  %v82_v24 = vand.u32 2147483647, %v72_v17  ;;  %vm78_vm7 = vweird.f32 %v72_v17 }
  0xff   :  { %137 = vlog2.f32 %v61_v16 }
 0x100   :  { %v85_v27 = vor.u32 1.1754944e-38, %v84_v22  ;;  %vm83_vm9 = vcmp.eq.f32.partialorder %v82_v24, 8.507059e+37 }
 0x104   :  { %v136_v18 = vpop.eup %135 }
 0x105   :  { %v74_v19 = vmul.f32 %v136_v18, %v72_v17  ;;  %v138_v20 = vpop.eup %137  ;;  %vm79_vm6 = vweird.f32 %v136_v18 }
 0x106   :  { %v63_v25 = vmul.f32 0.6931472, %v138_v20  ;;  %vm80_vm8 = vmor %vm78_vm7, %vm79_vm6 }
 0x107   :  { %v75_v21 = vsub.f32 1.0, %v74_v19 }
 0x108   :  { %v64_v29 = vadd.f32 0.01, %v63_v25 }
 0x109   :  { %v76_v23 = vmul.f32 %v136_v18, %v75_v21 }
 0x10b   :  { %v77_v26 = vadd.f32 %v136_v18, %v76_v23 }
 0x10d   :  { %v81_v28 = vsel %vm80_vm8, %v136_v18, %v77_v26 }
 0x10e   :  { %v86_v30 = vsel %vm83_vm9, %v85_v27, %v81_v28 }
 0x10f   :  { %v87_v31 = vmul.f32 %v134_v2, %v86_v30 }
 0x111   :  { %v89_v32 = vsel %vm88_vm10, %v64_v29, %v87_v31 }
 0x112   :  { %91 = vst.msk [vmem:[#allocation8] sm:$0x3] %vm90_vm11, %v89_v32 }
 0x113   :  { %113 = dma.vmem_to_hbm [thread:$0]  %s109_s26, 32, %s111_s29, [#allocation9]  }
 0x114   :  { %239 = dma.done.wait [#allocation4], 32  }
 0x115   :  { %240 = vsyncadd [#allocation4], 4294967264 }
 0x116   :  { %241 = dma.done.wait [#allocation9], 32  }
 0x117   :  { %242 = vsyncadd [#allocation9], 4294967264 }
 0x118   :  { %122 = vsyncpa [#allocation3], 1 }
 0x119   :  { %123 = vsyncpa [#allocation6], 1 }
 0x11a   :  { %124 = vsyncpa [#allocation4], 1 }
 0x11b   :  { %125 = vsyncpa [#allocation9], 1 }

</bundles_post_ra>
